<compile_context>
chip_gen: v5e
topology: v5e:2x2
jax: 0.10.0
libtpu: 0.0.40
codegen_flags: <defaults>
</compile_context>

<pallas_src>
import functools

import numpy as np
import jax
import jax.numpy as jnp
from jax import lax
from jax.experimental import pallas as pl
from jax.experimental.pallas import tpu as pltpu

# ----------------------------- module hyper-params -----------------------------
IN_CHANNELS = 4
CHANNELS = 4                     # `channels`
KERNEL_SIZE = 3
STRIDE = 1
PADDING = 1
DILATION = 1
GROUPS = 1                       # cardinality
RADIX = 2
REDUCTION_FACTOR = 4
INTER_CHANNELS = max(IN_CHANNELS * RADIX // REDUCTION_FACTOR, 32)

COUT = CHANNELS * RADIX          # conv output channels
CONV_GROUPS = GROUPS * RADIX
CIN_G = IN_CHANNELS // CONV_GROUPS
COUT_G = COUT // CONV_GROUPS     # == CHANNELS // GROUPS

# TODO(synk): general stride / dilation > 1 not implemented (this config uses 1/1,
# as in the ResNeSt split-attention block with padding=1).
assert STRIDE == 1 and DILATION == 1


# ------------------------------ fused Pallas kernel -----------------------------
def _splat_kernel(x_ref, w_ref, b_ref, s2_ref, w1_ref, b1_ref, w2_ref, b2_ref,
                  tsel_ref, p_ref, o_ref, xp_ref, att_ref, *,
                  H, W, Ho, KH, Cin, padding,
                  channels, radix, cardinality, inter_channels):
    """One batch element per grid step.

    x_ref   : (1, H, W*Cin)              lane-folded input
    w_ref   : (KH, Wp*Cin, Wo*COUT)      block-structured conv weight
    b_ref   : (1, Wo*COUT)               conv bias, tiled over Wo
    s2_ref  : (Wo*COUT, C)               radix-sum + spatial-mean selection
    w1_ref  : (K, C/K, inter/K)          fc1 per-group weights (transposed)
    b1_ref  : (1, inter)
    w2_ref  : (K, inter/K, C*R/K)        fc2 per-group weights (transposed)
    b2_ref  : (1, C*R)
    tsel_ref: (COUT, Wo*COUT)            attention lane-broadcast selection
    p_ref   : (Wo*COUT, Wo*C)            radix-sum + lane-compaction selection
    o_ref   : (1, Ho, Wo*C)              output (lane-dense)
    xp_ref  : (Hp, Wp*Cin)               VMEM scratch: padded, lane-folded input
    att_ref : (1, COUT)                  VMEM scratch: attention weights
    """
    # ---- padded, lane-folded input built in VMEM (no host-side jnp.pad) ----
    xp_ref[...] = jnp.zeros_like(xp_ref)
    xp_ref[padding:padding + H, padding * Cin:padding * Cin + W * Cin] = x_ref[0]

    # ---- conv + bias + ReLU: KH accumulated matmuls, lane-dense (Ho, Wo*COUT) ----
    y = jnp.dot(xp_ref[0:Ho, :], w_ref[0], preferred_element_type=jnp.float32)
    for kh in range(1, KH):
        y = y + jnp.dot(xp_ref[kh:kh + Ho, :], w_ref[kh],
                        preferred_element_type=jnp.float32)
    y = jnp.maximum(y + b_ref[...], 0.0)                       # (Ho, Wo*COUT)

    # ---- GAP of the radix-summed splits (mean scale folded into s2) ----
    colsum = jnp.sum(y, axis=0, keepdims=True)                 # (1, Wo*COUT)
    gap = jnp.dot(colsum, s2_ref[...],
                  preferred_element_type=jnp.float32)          # (1, C)

    # ---- fc1 -> ReLU -> fc2 -> rSoftMax (per cardinality group) ----
    K, R, C = cardinality, radix, channels
    rest = C // K
    ipg = inter_channels // K
    opg = (C * R) // K
    b1 = b1_ref[...]
    b2 = b2_ref[...]
    for g in range(K):
        xg = gap[:, g * rest:(g + 1) * rest]
        hg = jnp.dot(xg, w1_ref[g], preferred_element_type=jnp.float32)
        hg = jnp.maximum(hg + b1[:, g * ipg:(g + 1) * ipg], 0.0)       # fc1 + relu
        lg = jnp.dot(hg, w2_ref[g], preferred_element_type=jnp.float32)
        lg = lg + b2[:, g * opg:(g + 1) * opg]                         # fc2 logits
        if R > 1:
            # softmax across the radix axis, written in torch `atten` channel order.
            chunks = [lg[:, r * rest:(r + 1) * rest] for r in range(R)]
            m = chunks[0]
            for r in range(1, R):
                m = jnp.maximum(m, chunks[r])
            es = [jnp.exp(c - m) for c in chunks]
            den = es[0]
            for r in range(1, R):
                den = den + es[r]
            inv = 1.0 / den
            for r in range(R):
                att_ref[:, r * C + g * rest:r * C + (g + 1) * rest] = es[r] * inv
        else:
            att_ref[:, g * opg:(g + 1) * opg] = jax.nn.sigmoid(lg)

    # ---- attention-weighted radix sum, compacted to lane-dense (Ho, Wo*C) ----
    a_t = jnp.dot(att_ref[...], tsel_ref[...],
                  preferred_element_type=jnp.float32)          # (1, Wo*COUT)
    o_ref[0] = jnp.dot(y * a_t, p_ref[...],
                       preferred_element_type=jnp.float32)     # (Ho, Wo*C)


# ------------------------------ public wrapper ----------------------------------
def splat_conv2d(x_nchw, params):
    """Forward pass of SplAtConv2d. Input/output are NCHW like the PyTorch module."""
    conv_w, conv_b, fc1_w, fc1_b, fc2_w, fc2_b = params   # torch-layout weights

    B, Cin, H, W = x_nchw.shape
    assert Cin == IN_CHANNELS
    Ho = (H + 2 * PADDING - DILATION * (KERNEL_SIZE - 1) - 1) // STRIDE + 1
    Wo = (W + 2 * PADDING - DILATION * (KERNEL_SIZE - 1) - 1) // STRIDE + 1
    Hp, Wp = H + 2 * PADDING, W + 2 * PADDING

    # Lane-folded NHWC input: (B, H, W*Cin).
    x_fold = jnp.transpose(x_nchw, (0, 2, 3, 1)).astype(jnp.float32).reshape(B, H, W * Cin)

    # ---- conv weight: grouped (COUT, CIN_G, KH, KW) -> (KH, Wp*Cin, Wo*COUT) ----
    # Bake in (a) the conv-group block structure and (b) the width unfold, exactly
    # (gather + where; no matmul so weight values are preserved bit-exact in f32).
    wr = conv_w.astype(jnp.float32).reshape(
        CONV_GROUPS, COUT_G, CIN_G, KERNEL_SIZE, KERNEL_SIZE)
    wg = jnp.transpose(wr, (3, 4, 0, 2, 1))                    # (KH, KW, G, cin_g, cout_g)
    blocks = []
    for g in range(CONV_GROUPS):
        blk = jnp.zeros((KERNEL_SIZE, KERNEL_SIZE, IN_CHANNELS, COUT_G), jnp.float32)
        blk = blk.at[:, :, g * CIN_G:(g + 1) * CIN_G, :].set(wg[:, :, g])
        blocks.append(blk)
    w_full = jnp.concatenate(blocks, axis=-1)                  # (KH, KW, Cin, COUT)

    kw = jnp.arange(Wp)[:, None] - jnp.arange(Wo)[None, :]     # (Wp, Wo)
    valid = (kw >= 0) & (kw < KERNEL_SIZE)
    kw_c = jnp.clip(kw, 0, KERNEL_SIZE - 1)
    gathered = w_full[:, kw_c]                                 # (KH, Wp, Wo, Cin, COUT)
    w_big = jnp.where(valid[None, :, :, None, None], gathered, 0.0)
    w_big = jnp.transpose(w_big, (0, 1, 3, 2, 4)).reshape(
        KERNEL_SIZE, Wp * IN_CHANNELS, Wo * COUT)

    # Conv bias tiled over Wo: lane index = wo*COUT + co.
    b_fold = jnp.tile(conv_b.astype(jnp.float32)[None, :], (1, Wo))        # (1, Wo*COUT)

    # ---- constant 0/1 selection matrices (stay VMEM-resident) ----
    n = jnp.arange(Wo * COUT)
    m = jnp.arange(Wo * CHANNELS)
    j_n = (n % COUT) % CHANNELS
    # GAP: sum over (wo, radix) with the spatial mean folded in.
    s2 = (j_n[:, None] == jnp.arange(CHANNELS)[None, :]).astype(jnp.float32) / float(Ho * Wo)
    # Attention lane-broadcast: att (1, COUT) -> (1, Wo*COUT).
    tsel = (jnp.arange(COUT)[:, None] == (n % COUT)[None, :]).astype(jnp.float32)
    # Combine: radix-sum + compaction of (wo, co) lanes down to (wo, channel) lanes.
    p_sel = (((n // COUT)[:, None] == (m // CHANNELS)[None, :])
             & (j_n[:, None] == (m % CHANNELS)[None, :])).astype(jnp.float32)

    # ---- fc1 / fc2 (grouped 1x1 convs) -> per-group (in, out) matmul weights ----
    ipg = INTER_CHANNELS // GROUPS
    opg = (CHANNELS * RADIX) // GROUPS
    cpg = CHANNELS // GROUPS
    w1t = jnp.transpose(fc1_w[:, :, 0, 0].reshape(GROUPS, ipg, cpg), (0, 2, 1)).astype(jnp.float32)
    w2t = jnp.transpose(fc2_w[:, :, 0, 0].reshape(GROUPS, opg, ipg), (0, 2, 1)).astype(jnp.float32)
    b1_row = fc1_b.reshape(1, INTER_CHANNELS).astype(jnp.float32)
    b2_row = fc2_b.reshape(1, CHANNELS * RADIX).astype(jnp.float32)

    kernel = functools.partial(
        _splat_kernel, H=H, W=W, Ho=Ho, KH=KERNEL_SIZE, Cin=IN_CHANNELS,
        padding=PADDING, channels=CHANNELS, radix=RADIX, cardinality=GROUPS,
        inter_channels=INTER_CHANNELS)

    out_fold = pl.pallas_call(
        kernel,
        out_shape=jax.ShapeDtypeStruct((B, Ho, Wo * CHANNELS), jnp.float32),
        grid=(B,),
        in_specs=[
            pl.BlockSpec((1, H, W * IN_CHANNELS), lambda b: (b, 0, 0)),
            pl.BlockSpec((KERNEL_SIZE, Wp * IN_CHANNELS, Wo * COUT), lambda b: (0, 0, 0)),
            pl.BlockSpec((1, Wo * COUT), lambda b: (0, 0)),
            pl.BlockSpec((Wo * COUT, CHANNELS), lambda b: (0, 0)),
            pl.BlockSpec((GROUPS, cpg, ipg), lambda b: (0, 0, 0)),
            pl.BlockSpec((1, INTER_CHANNELS), lambda b: (0, 0)),
            pl.BlockSpec((GROUPS, ipg, opg), lambda b: (0, 0, 0)),
            pl.BlockSpec((1, CHANNELS * RADIX), lambda b: (0, 0)),
            pl.BlockSpec((COUT, Wo * COUT), lambda b: (0, 0)),
            pl.BlockSpec((Wo * COUT, Wo * CHANNELS), lambda b: (0, 0)),
        ],
        out_specs=pl.BlockSpec((1, Ho, Wo * CHANNELS), lambda b: (b, 0, 0)),
        scratch_shapes=[
            pltpu.VMEM((Hp, Wp * IN_CHANNELS), jnp.float32),   # padded input
            pltpu.VMEM((1, COUT), jnp.float32),                # attention row
        ],
        compiler_params=pltpu.CompilerParams(dimension_semantics=("parallel",)),
    )(x_fold, w_big, b_fold, s2, w1t, b1_row, w2t, b2_row, tsel, p_sel)

    out = out_fold.reshape(B, Ho, Wo, CHANNELS)
    return jnp.transpose(out, (0, 3, 1, 2))                    # -> NCHW


# ------------------------------ pure-JAX reference ------------------------------
def reference(x_nchw, params):
    conv_w, conv_b, fc1_w, fc1_b, fc2_w, fc2_b = params
    x = jnp.transpose(x_nchw, (0, 2, 3, 1))
    w_hwio = jnp.transpose(conv_w, (2, 3, 1, 0))
    y = lax.conv_general_dilated(
        x, w_hwio, window_strides=(STRIDE, STRIDE),
        padding=((PADDING, PADDING), (PADDING, PADDING)),
        rhs_dilation=(DILATION, DILATION),
        dimension_numbers=('NHWC', 'HWIO', 'NHWC'),
        feature_group_count=CONV_GROUPS)
    y = jnp.maximum(y + conv_b[None, None, None, :], 0.0)
    splits = [y[..., r * CHANNELS:(r + 1) * CHANNELS] for r in range(RADIX)]
    gap = sum(splits).mean(axis=(1, 2))
    K = GROUPS
    ipg = INTER_CHANNELS // K
    opg = (CHANNELS * RADIX) // K
    cpg = CHANNELS // K
    h = jnp.concatenate(
        [gap[:, g * cpg:(g + 1) * cpg] @ fc1_w[g * ipg:(g + 1) * ipg, :, 0, 0].T
         for g in range(K)], axis=-1) + fc1_b[None, :]
    h = jnp.maximum(h, 0.0)
    logits = jnp.concatenate(
        [h[:, g * ipg:(g + 1) * ipg] @ fc2_w[g * opg:(g + 1) * opg, :, 0, 0].T
         for g in range(K)], axis=-1) + fc2_b[None, :]
    B = x.shape[0]
    if RADIX > 1:
        t = jnp.swapaxes(logits.reshape(B, K, RADIX, -1), 1, 2)
        att = jax.nn.softmax(t, axis=1).reshape(B, -1)
    else:
        att = jax.nn.sigmoid(logits)
    out = sum(att[:, r * CHANNELS:(r + 1) * CHANNELS][:, None, None, :] * splits[r]
              for r in range(RADIX))
    return jnp.transpose(out, (0, 3, 1, 2))


# ------------------------------------ main --------------------------------------
if __name__ == "__main__":
    key = jax.random.PRNGKey(0)
    ks = jax.random.split(key, 7)
    x = jax.random.normal(ks[0], (2, IN_CHANNELS, 16, 16), jnp.float32)
    conv_w = 0.1 * jax.random.normal(ks[1], (COUT, CIN_G, KERNEL_SIZE, KERNEL_SIZE), jnp.float32)
    conv_b = 0.1 * jax.random.normal(ks[2], (COUT,), jnp.float32)
    fc1_w = 0.1 * jax.random.normal(ks[3], (INTER_CHANNELS, CHANNELS // GROUPS, 1, 1), jnp.float32)
    fc1_b = 0.1 * jax.random.normal(ks[4], (INTER_CHANNELS,), jnp.float32)
    fc2_w = 0.1 * jax.random.normal(ks[5], (CHANNELS * RADIX, INTER_CHANNELS // GROUPS, 1, 1), jnp.float32)
    fc2_b = 0.1 * jax.random.normal(ks[6], (CHANNELS * RADIX,), jnp.float32)
    params = (conv_w, conv_b, fc1_w, fc1_b, fc2_w, fc2_b)

    splat_jit = jax.jit(splat_conv2d)
    out = jax.block_until_ready(splat_jit(x, params))
    ref = jax.block_until_ready(reference(x, params))
    assert out.shape == (2, CHANNELS, 16, 16)
    np.testing.assert_allclose(np.asarray(out), np.asarray(ref), rtol=1e-4, atol=1e-4)
    print("KERNEL_OK")
</pallas_src>

<mosaic_0001>
module attributes {stable_mosaic.version = 11 : i64} {
  func.func @_splat_kernel(%arg0: i32, %arg1: memref<1x16x64xf32, #tpu.memory_space<vmem>>, %arg2: memref<3x72x128xf32, #tpu.memory_space<vmem>>, %arg3: memref<1x128xf32, #tpu.memory_space<vmem>>, %arg4: memref<128x4xf32, #tpu.memory_space<vmem>>, %arg5: memref<1x4x32xf32, #tpu.memory_space<vmem>>, %arg6: memref<1x32xf32, #tpu.memory_space<vmem>>, %arg7: memref<1x32x8xf32, #tpu.memory_space<vmem>>, %arg8: memref<1x8xf32, #tpu.memory_space<vmem>>, %arg9: memref<8x128xf32, #tpu.memory_space<vmem>>, %arg10: memref<128x64xf32, #tpu.memory_space<vmem>>, %arg11: memref<1x16x64xf32, #tpu.memory_space<vmem>>, %arg12: memref<18x72xf32, #tpu.memory_space<vmem>>, %arg13: memref<1x8xf32, #tpu.memory_space<vmem>>) attributes {dimension_semantics = [#tpu.dimension_semantics<parallel>], iteration_bounds = array<i64: 2>, scalar_prefetch = 0 : i64, scratch_operands = 2 : i64, tpu.core_type = #tpu.core_type<tc>, window_params = [{transform_indices = @transform_0, window_bounds = array<i64: 1, 16, 64>}, {pipeline_mode = #tpu.pipeline_mode<synchronous>, transform_indices = @transform_1, window_bounds = array<i64: 3, 72, 128>}, {pipeline_mode = #tpu.pipeline_mode<synchronous>, transform_indices = @transform_2, window_bounds = array<i64: 1, 128>}, {pipeline_mode = #tpu.pipeline_mode<synchronous>, transform_indices = @transform_3, window_bounds = array<i64: 128, 4>}, {pipeline_mode = #tpu.pipeline_mode<synchronous>, transform_indices = @transform_4, window_bounds = array<i64: 1, 4, 32>}, {pipeline_mode = #tpu.pipeline_mode<synchronous>, transform_indices = @transform_5, window_bounds = array<i64: 1, 32>}, {pipeline_mode = #tpu.pipeline_mode<synchronous>, transform_indices = @transform_6, window_bounds = array<i64: 1, 32, 8>}, {pipeline_mode = #tpu.pipeline_mode<synchronous>, transform_indices = @transform_7, window_bounds = array<i64: 1, 8>}, {pipeline_mode = #tpu.pipeline_mode<synchronous>, transform_indices = @transform_8, window_bounds = array<i64: 8, 128>}, {pipeline_mode = #tpu.pipeline_mode<synchronous>, transform_indices = @transform_9, window_bounds = array<i64: 128, 64>}, {transform_indices = @transform_10, window_bounds = array<i64: 1, 16, 64>}]} {
    %cst = arith.constant 0.000000e+00 : f32
    %0 = vector.broadcast %cst : f32 to vector<18x72xf32>
    %c0 = arith.constant 0 : index
    %c0_0 = arith.constant 0 : index
    %1 = vector.load %arg12[%c0, %c0_0] : memref<18x72xf32, #tpu.memory_space<vmem>>, vector<18x72xf32>
    tpu.vector_store %arg12[%c0, %c0_0], %0 {strides = array<i32>} : memref<18x72xf32, #tpu.memory_space<vmem>>, vector<18x72xf32>,
    %c0_1 = arith.constant 0 : index
    %c0_2 = arith.constant 0 : index
    %c0_3 = arith.constant 0 : index
    %2 = vector.load %arg1[%c0_1, %c0_2, %c0_3] : memref<1x16x64xf32, #tpu.memory_space<vmem>>, vector<1x16x64xf32>
    %3 = vector.shape_cast %2 : vector<1x16x64xf32> to vector<16x64xf32>
    %c1 = arith.constant 1 : index
    %c4 = arith.constant 4 : index
    %4 = vector.load %arg12[%c1, %c4] : memref<18x72xf32, #tpu.memory_space<vmem>>, vector<16x64xf32>
    tpu.vector_store %arg12[%c1, %c4], %3 {strides = array<i32>} : memref<18x72xf32, #tpu.memory_space<vmem>>, vector<16x64xf32>,
    %c0_4 = arith.constant 0 : index
    %c0_5 = arith.constant 0 : index
    %5 = vector.load %arg12[%c0_4, %c0_5] : memref<18x72xf32, #tpu.memory_space<vmem>>, vector<16x72xf32>
    %c0_6 = arith.constant 0 : index
    %c0_7 = arith.constant 0 : index
    %c0_8 = arith.constant 0 : index
    %6 = vector.load %arg2[%c0_6, %c0_7, %c0_8] : memref<3x72x128xf32, #tpu.memory_space<vmem>>, vector<1x72x128xf32>
    %7 = vector.shape_cast %6 : vector<1x72x128xf32> to vector<72x128xf32>
    %cst_9 = arith.constant dense<0.000000e+00> : vector<16x128xf32>
    %8 = tpu.matmul %5, %7, %cst_9 {dimension_numbers = #tpu.dot_dimension_numbers<[1], [0], [0], [1], [0, 0, 1, 1], [], []>} : vector<16x72xf32>, vector<72x128xf32>, vector<16x128xf32> -> vector<16x128xf32>
    %c1_10 = arith.constant 1 : index
    %c0_11 = arith.constant 0 : index
    %9 = vector.load %arg12[%c1_10, %c0_11] : memref<18x72xf32, #tpu.memory_space<vmem>>, vector<16x72xf32>
    %c1_12 = arith.constant 1 : index
    %c0_13 = arith.constant 0 : index
    %c0_14 = arith.constant 0 : index
    %10 = vector.load %arg2[%c1_12, %c0_13, %c0_14] : memref<3x72x128xf32, #tpu.memory_space<vmem>>, vector<1x72x128xf32>
    %11 = vector.shape_cast %10 : vector<1x72x128xf32> to vector<72x128xf32>
    %cst_15 = arith.constant dense<0.000000e+00> : vector<16x128xf32>
    %12 = tpu.matmul %9, %11, %cst_15 {dimension_numbers = #tpu.dot_dimension_numbers<[1], [0], [0], [1], [0, 0, 1, 1], [], []>} : vector<16x72xf32>, vector<72x128xf32>, vector<16x128xf32> -> vector<16x128xf32>
    %13 = arith.addf %8, %12 : vector<16x128xf32>
    %c2 = arith.constant 2 : index
    %c0_16 = arith.constant 0 : index
    %14 = vector.load %arg12[%c2, %c0_16] : memref<18x72xf32, #tpu.memory_space<vmem>>, vector<16x72xf32>
    %c2_17 = arith.constant 2 : index
    %c0_18 = arith.constant 0 : index
    %c0_19 = arith.constant 0 : index
    %15 = vector.load %arg2[%c2_17, %c0_18, %c0_19] : memref<3x72x128xf32, #tpu.memory_space<vmem>>, vector<1x72x128xf32>
    %16 = vector.shape_cast %15 : vector<1x72x128xf32> to vector<72x128xf32>
    %cst_20 = arith.constant dense<0.000000e+00> : vector<16x128xf32>
    %17 = tpu.matmul %14, %16, %cst_20 {dimension_numbers = #tpu.dot_dimension_numbers<[1], [0], [0], [1], [0, 0, 1, 1], [], []>} : vector<16x72xf32>, vector<72x128xf32>, vector<16x128xf32> -> vector<16x128xf32>
    %18 = arith.addf %13, %17 : vector<16x128xf32>
    %c0_21 = arith.constant 0 : index
    %c0_22 = arith.constant 0 : index
    %19 = vector.load %arg3[%c0_21, %c0_22] : memref<1x128xf32, #tpu.memory_space<vmem>>, vector<1x128xf32>
    %20 = vector.broadcast %19 : vector<1x128xf32> to vector<16x128xf32>
    %21 = arith.addf %18, %20 : vector<16x128xf32>
    %cst_23 = arith.constant 0.000000e+00 : f32
    %22 = vector.broadcast %cst_23 : f32 to vector<16x128xf32>
    %23 = arith.maximumf %21, %22 : vector<16x128xf32>
    %cst_24 = arith.constant dense<0.000000e+00> : vector<128xf32>
    %24 = vector.multi_reduction <add>, %23, %cst_24 [0] : vector<16x128xf32> to vector<128xf32>
    %25 = vector.shape_cast %24 : vector<128xf32> to vector<1x128xf32>
    %c0_25 = arith.constant 0 : index
    %c0_26 = arith.constant 0 : index
    %26 = vector.load %arg4[%c0_25, %c0_26] : memref<128x4xf32, #tpu.memory_space<vmem>>, vector<128x4xf32>
    %cst_27 = arith.constant dense<0.000000e+00> : vector<1x4xf32>
    %27 = tpu.matmul %25, %26, %cst_27 {dimension_numbers = #tpu.dot_dimension_numbers<[1], [0], [0], [1], [0, 0, 1, 1], [], []>} : vector<1x128xf32>, vector<128x4xf32>, vector<1x4xf32> -> vector<1x4xf32>
    %c0_28 = arith.constant 0 : index
    %c0_29 = arith.constant 0 : index
    %28 = vector.load %arg6[%c0_28, %c0_29] : memref<1x32xf32, #tpu.memory_space<vmem>>, vector<1x32xf32>
    %c0_30 = arith.constant 0 : index
    %c0_31 = arith.constant 0 : index
    %29 = vector.load %arg8[%c0_30, %c0_31] : memref<1x8xf32, #tpu.memory_space<vmem>>, vector<1x8xf32>
    %c0_32 = arith.constant 0 : index
    %c0_33 = arith.constant 0 : index
    %c0_34 = arith.constant 0 : index
    %30 = vector.load %arg5[%c0_32, %c0_33, %c0_34] : memref<1x4x32xf32, #tpu.memory_space<vmem>>, vector<1x4x32xf32>
    %31 = vector.shape_cast %30 : vector<1x4x32xf32> to vector<4x32xf32>
    %cst_35 = arith.constant dense<0.000000e+00> : vector<1x32xf32>
    %32 = tpu.matmul %27, %31, %cst_35 {dimension_numbers = #tpu.dot_dimension_numbers<[1], [0], [0], [1], [0, 0, 1, 1], [], []>} : vector<1x4xf32>, vector<4x32xf32>, vector<1x32xf32> -> vector<1x32xf32>
    %33 = arith.addf %32, %28 : vector<1x32xf32>
    %cst_36 = arith.constant 0.000000e+00 : f32
    %34 = vector.broadcast %cst_36 : f32 to vector<1x32xf32>
    %35 = arith.maximumf %33, %34 : vector<1x32xf32>
    %c0_37 = arith.constant 0 : index
    %c0_38 = arith.constant 0 : index
    %c0_39 = arith.constant 0 : index
    %36 = vector.load %arg7[%c0_37, %c0_38, %c0_39] : memref<1x32x8xf32, #tpu.memory_space<vmem>>, vector<1x32x8xf32>
    %37 = vector.shape_cast %36 : vector<1x32x8xf32> to vector<32x8xf32>
    %cst_40 = arith.constant dense<0.000000e+00> : vector<1x8xf32>
    %38 = tpu.matmul %35, %37, %cst_40 {dimension_numbers = #tpu.dot_dimension_numbers<[1], [0], [0], [1], [0, 0, 1, 1], [], []>} : vector<1x32xf32>, vector<32x8xf32>, vector<1x8xf32> -> vector<1x8xf32>
    %39 = arith.addf %38, %29 : vector<1x8xf32>
    %40 = vector.extract_strided_slice %39 {offsets = [0, 0], sizes = [1, 4], strides = [1, 1]} : vector<1x8xf32> to vector<1x4xf32>
    %41 = vector.extract_strided_slice %39 {offsets = [0, 4], sizes = [1, 4], strides = [1, 1]} : vector<1x8xf32> to vector<1x4xf32>
    %42 = arith.maximumf %40, %41 : vector<1x4xf32>
    %43 = arith.subf %40, %42 : vector<1x4xf32>
    %44 = math.exp %43 : vector<1x4xf32>
    %45 = arith.subf %41, %42 : vector<1x4xf32>
    %46 = math.exp %45 : vector<1x4xf32>
    %47 = arith.addf %44, %46 : vector<1x4xf32>
    %cst_41 = arith.constant 1.000000e+00 : f32
    %48 = vector.broadcast %cst_41 : f32 to vector<1x4xf32>
    %49 = arith.divf %48, %47 : vector<1x4xf32>
    %50 = arith.mulf %44, %49 : vector<1x4xf32>
    %c0_42 = arith.constant 0 : index
    %c0_43 = arith.constant 0 : index
    %51 = vector.load %arg13[%c0_42, %c0_43] : memref<1x8xf32, #tpu.memory_space<vmem>>, vector<1x4xf32>
    tpu.vector_store %arg13[%c0_42, %c0_43], %50 {strides = array<i32>} : memref<1x8xf32, #tpu.memory_space<vmem>>, vector<1x4xf32>,
    %52 = arith.mulf %46, %49 : vector<1x4xf32>
    %c0_44 = arith.constant 0 : index
    %c4_45 = arith.constant 4 : index
    %53 = vector.load %arg13[%c0_44, %c4_45] : memref<1x8xf32, #tpu.memory_space<vmem>>, vector<1x4xf32>
    tpu.vector_store %arg13[%c0_44, %c4_45], %52 {strides = array<i32>} : memref<1x8xf32, #tpu.memory_space<vmem>>, vector<1x4xf32>,
    %c0_46 = arith.constant 0 : index
    %c0_47 = arith.constant 0 : index
    %54 = vector.load %arg13[%c0_46, %c0_47] : memref<1x8xf32, #tpu.memory_space<vmem>>, vector<1x8xf32>
    %c0_48 = arith.constant 0 : index
    %c0_49 = arith.constant 0 : index
    %55 = vector.load %arg9[%c0_48, %c0_49] : memref<8x128xf32, #tpu.memory_space<vmem>>, vector<8x128xf32>
    %cst_50 = arith.constant dense<0.000000e+00> : vector<1x128xf32>
    %56 = tpu.matmul %54, %55, %cst_50 {dimension_numbers = #tpu.dot_dimension_numbers<[1], [0], [0], [1], [0, 0, 1, 1], [], []>} : vector<1x8xf32>, vector<8x128xf32>, vector<1x128xf32> -> vector<1x128xf32>
    %57 = vector.broadcast %56 : vector<1x128xf32> to vector<16x128xf32>
    %58 = arith.mulf %23, %57 : vector<16x128xf32>
    %c0_51 = arith.constant 0 : index
    %c0_52 = arith.constant 0 : index
    %59 = vector.load %arg10[%c0_51, %c0_52] : memref<128x64xf32, #tpu.memory_space<vmem>>, vector<128x64xf32>
    %cst_53 = arith.constant dense<0.000000e+00> : vector<16x64xf32>
    %60 = tpu.matmul %58, %59, %cst_53 {dimension_numbers = #tpu.dot_dimension_numbers<[1], [0], [0], [1], [0, 0, 1, 1], [], []>} : vector<16x128xf32>, vector<128x64xf32>, vector<16x64xf32> -> vector<16x64xf32>
    %c0_54 = arith.constant 0 : index
    %c0_55 = arith.constant 0 : index
    %c0_56 = arith.constant 0 : index
    %61 = vector.load %arg11[%c0_54, %c0_55, %c0_56] : memref<1x16x64xf32, #tpu.memory_space<vmem>>, vector<1x16x64xf32>
    %62 = vector.shape_cast %61 : vector<1x16x64xf32> to vector<16x64xf32>
    %63 = vector.shape_cast %60 : vector<16x64xf32> to vector<1x16x64xf32>
    tpu.vector_store %arg11[%c0_54, %c0_55, %c0_56], %63 {strides = array<i32>} : memref<1x16x64xf32, #tpu.memory_space<vmem>>, vector<1x16x64xf32>,
    return
  }
  func.func @transform_0(%arg0: i32) -> (i32, i32, i32) {
    %c0_i32 = arith.constant 0 : i32
    %c0_i32_0 = arith.constant 0 : i32
    %c0_i32_1 = arith.constant 0 : i32
    return %arg0, %c0_i32, %c0_i32_0 : i32, i32, i32
  }
  func.func @transform_1(%arg0: i32) -> (i32, i32, i32) {
    %c0_i32 = arith.constant 0 : i32
    %c0_i32_0 = arith.constant 0 : i32
    %c0_i32_1 = arith.constant 0 : i32
    %c0_i32_2 = arith.constant 0 : i32
    return %c0_i32, %c0_i32_0, %c0_i32_1 : i32, i32, i32
  }
  func.func @transform_2(%arg0: i32) -> (i32, i32) {
    %c0_i32 = arith.constant 0 : i32
    %c0_i32_0 = arith.constant 0 : i32
    %c0_i32_1 = arith.constant 0 : i32
    return %c0_i32, %c0_i32_0 : i32, i32
  }
  func.func @transform_3(%arg0: i32) -> (i32, i32) {
    %c0_i32 = arith.constant 0 : i32
    %c0_i32_0 = arith.constant 0 : i32
    %c0_i32_1 = arith.constant 0 : i32
    return %c0_i32, %c0_i32_0 : i32, i32
  }
  func.func @transform_4(%arg0: i32) -> (i32, i32, i32) {
    %c0_i32 = arith.constant 0 : i32
    %c0_i32_0 = arith.constant 0 : i32
    %c0_i32_1 = arith.constant 0 : i32
    %c0_i32_2 = arith.constant 0 : i32
    return %c0_i32, %c0_i32_0, %c0_i32_1 : i32, i32, i32
  }
  func.func @transform_5(%arg0: i32) -> (i32, i32) {
    %c0_i32 = arith.constant 0 : i32
    %c0_i32_0 = arith.constant 0 : i32
    %c0_i32_1 = arith.constant 0 : i32
    return %c0_i32, %c0_i32_0 : i32, i32
  }
  func.func @transform_6(%arg0: i32) -> (i32, i32, i32) {
    %c0_i32 = arith.constant 0 : i32
    %c0_i32_0 = arith.constant 0 : i32
    %c0_i32_1 = arith.constant 0 : i32
    %c0_i32_2 = arith.constant 0 : i32
    return %c0_i32, %c0_i32_0, %c0_i32_1 : i32, i32, i32
  }
  func.func @transform_7(%arg0: i32) -> (i32, i32) {
    %c0_i32 = arith.constant 0 : i32
    %c0_i32_0 = arith.constant 0 : i32
    %c0_i32_1 = arith.constant 0 : i32
    return %c0_i32, %c0_i32_0 : i32, i32
  }
  func.func @transform_8(%arg0: i32) -> (i32, i32) {
    %c0_i32 = arith.constant 0 : i32
    %c0_i32_0 = arith.constant 0 : i32
    %c0_i32_1 = arith.constant 0 : i32
    return %c0_i32, %c0_i32_0 : i32, i32
  }
  func.func @transform_9(%arg0: i32) -> (i32, i32) {
    %c0_i32 = arith.constant 0 : i32
    %c0_i32_0 = arith.constant 0 : i32
    %c0_i32_1 = arith.constant 0 : i32
    return %c0_i32, %c0_i32_0 : i32, i32
  }
  func.func @transform_10(%arg0: i32) -> (i32, i32, i32) {
    %c0_i32 = arith.constant 0 : i32
    %c0_i32_0 = arith.constant 0 : i32
    %c0_i32_1 = arith.constant 0 : i32
    return %arg0, %c0_i32, %c0_i32_0 : i32, i32, i32
  }
}

</mosaic_0001>

<bundles_post_ra>
// kernel: splat_conv2d.1
= control target key start
LH: loop header
LB: loop body
LE: loop exit
PB: predicated region body
PF: predicated region fallthrough
CT: control target
= control target key end

     0   :  { %s909_s13 = smov 0   ;;  %s1163_s0 = inlined_call_operand.vmem [shape: f32[2,16,64], index: 0, kind: input, shape index: {}]   ;;  %s1164_s1 = inlined_call_operand.vmem [shape: f32[3,72,128], index: 1, kind: input, shape index: {}]   ;;  %s1165_s2 = inlined_call_operand.vmem [shape: f32[1,128], index: 2, kind: input, shape index: {}]   ;;  %s1166_s3 = inlined_call_operand.vmem [shape: f32[128,4], index: 3, kind: input, shape index: {}]   ;;  %s1167_s4 = inlined_call_operand.vmem [shape: f32[1,4,32], index: 4, kind: input, shape index: {}]   ;;  %s1168_s5 = inlined_call_operand.vmem [shape: f32[1,32], index: 5, kind: input, shape index: {}]   ;;  %s1169_s6 = inlined_call_operand.vmem [shape: f32[1,32,8], index: 6, kind: input, shape index: {}]   ;;  %s1170_s7 = inlined_call_operand.vmem [shape: f32[1,8], index: 7, kind: input, shape index: {}]   ;;  %s1171_s8 = inlined_call_operand.vmem [shape: f32[8,128], index: 8, kind: input, shape index: {}]   ;;  %s1172_s9 = inlined_call_operand.vmem [shape: f32[128,64], index: 9, kind: input, shape index: {}]   ;;  %s1173_s10 = inlined_call_operand.vmem [shape: f32[2,16,64], index: 10, kind: output, shape index: {}]  }
   0x1 LB: > { %s784_s14 = sadd.s32 4294967295, %s849_s13   ;;  %p788_p0 = scmp.ge.s32.totalorder %s849_s13, 1  ;;  %s849_s13 = sphi %s909_s13, %s20_s13  }
   0x2   : > { %p312_p1 = scmp.lt.s32.totalorder %s849_s13, 3 }
   0x4   : > { %p313_p2 = pnand %p788_p0, %p312_p1 }
   0x5   : > { %p350_p3 = scmp.lt.s32.totalorder (!%p313_p2), %s784_s14, 1  ;;  %s852_s21 = smov (!%p313_p2), 4  }
   0x6   : > { %316 = sbr.rel (%p313_p2) target bundleno = 1423 (0x58f), region = 60  ;;  %s853_s24 = smov (!%p313_p2), 124  }
   0xb   : > { %v801_v0 = vld [vmem:[%s1164_s1 + $0x88] sm:$0xff]  ;;  %v388_v1 = vld [vmem:[%s1164_s1 + $0x40] sm:$0xff]  ;;  %vm360_vm0 = vcmask 588800   ;;  %v387_v3 = vld [vmem:[%s1164_s1 + $0x38] sm:$0xff]  ;;  %s1175_s14 = smov (!%p350_p3, %s784_s14), 1  ;;  %v851_v6 = vmov 0.0  }
   0xc   : > { %v800_v2 = vld [vmem:[%s1164_s1 + $0x80] sm:$0xff]  ;;  %414 = vmatpush.msra.mxu0 %v801_v0  ;;  %443 = vmatpush.msra.mxu1 %v388_v1  ;;  %v799_v4 = vld [vmem:[%s1164_s1 + $0x78] sm:$0xff]  ;;  %v386_v5 = vld [vmem:[%s1164_s1 + $0x30] sm:$0xff]  ;;  %361 = vst.msk [vmem:[#allocation2] sm:$0xff] %vm360_vm0, %v851_v6  ;;  %s823_s29 = sshll.u32 %s1175_s14, 4  ;;  %vm363_vm1 = vcmask 582656  }
   0xd   : > { %v814_v7 = vld [vmem:[%s1164_s1 + $0xd0] sm:$0xff]  ;;  %362 = vst.msk [vmem:[#allocation2 + $0x8] sm:$0xff] %vm360_vm0, %v851_v6  ;;  %s354_s16 = scalar_lea.vmem %s1163_s0, %s823_s29  ;;  %v385_v9 = vld [vmem:[%s1164_s1 + $0x28] sm:$0xff]  ;;  %v384_v12 = vld [vmem:[%s1164_s1 + $0x20] sm:$0xff]  ;;  %vm375_vm2 = vcmask 556064   ;;  %vm560_vm3 = vcmask 1043456   ;;  %s359_s27 = scalar_lea.vmem %s1173_s10, %s823_s29 }
   0xe   : > { %415 = vmatpush.msra.mxu0 %v800_v2  ;;  %444 = vmatpush.msra.mxu1 %v387_v3  ;;  %v798_v8 = vld [vmem:[%s1164_s1 + $0x70] sm:$0xff]  ;;  %v365_v10 = vld [vmem:[%s354_s16] sm:$0xff]  ;;  %v797_v11 = vld [vmem:[%s1164_s1 + $0x68] sm:$0xff]  ;;  %364 = vst.msk [vmem:[#allocation2 + $0x10] sm:$0x3] %vm363_vm1, %v851_v6  ;;  %vm556_vm4 = vcmask 31744  }
   0xf   : > { %484 = vmatpush.msra.mxu2 %v814_v7  ;;  %369 = vrot.lane.b32.xlu0 %v365_v10, %s852_s21  ;;  %v366_v13 = vld [vmem:[%s354_s16 + $0x8] sm:$0xff]  ;;  %v796_v14 = vld [vmem:[%s1164_s1 + $0x60] sm:$0xff]  ;;  %v383_v15 = vld [vmem:[%s1164_s1 + $0x18] sm:$0xff]  ;;  %vm589_vm5 = vcmask 261120   ;;  %vm649_vm10 = vcmask 24576   ;;  %vm656_vm11 = vcmask 57376  }
  0x10   : > { %416 = vmatpush.msra.mxu0 %v799_v4  ;;  %445 = vmatpush.msra.mxu1 %v386_v5  ;;  %v813_v16 = vld [vmem:[%s1164_s1 + $0xc8] sm:$0xff]  ;;  %v795_v17 = vld [vmem:[%s1164_s1 + $0x58] sm:$0xff]  ;;  %v382_v18 = vld [vmem:[%s1164_s1 + $0x10] sm:$0xff]  ;;  %vm660_vm12 = vcmask 64512   ;;  %vm726_vm13 = vcmask 523264  }
  0x11   : > { %v812_v19 = vld [vmem:[%s1164_s1 + $0xc0] sm:$0xff]  ;;  %485 = vmatpush.msra.mxu2 %v813_v16  ;;  %v794_v20 = vld [vmem:[%s1164_s1 + $0x50] sm:$0xff]  ;;  %v381_v21 = vld [vmem:[%s1164_s1 + $0x8] sm:$0xff] }
  0x12   : > { %417 = vmatpush.msra.mxu0 %v798_v8  ;;  %446 = vmatpush.msra.mxu1 %v385_v9  ;;  %v811_v22 = vld [vmem:[%s1164_s1 + $0xb8] sm:$0xff]  ;;  %v793_v23 = vld [vmem:[%s1164_s1 + $0x48] sm:$0xff]  ;;  %v380_v24 = vld [vmem:[%s1164_s1] sm:$0xff] }
  0x13   : > { %486 = vmatpush.msra.mxu2 %v812_v19  ;;  %v810_v25 = vld [vmem:[%s1164_s1 + $0xb0] sm:$0xff]  ;;  %v809_v26 = vld [vmem:[%s1164_s1 + $0xa8] sm:$0xff]  ;;  %v808_v27 = vld [vmem:[%s1164_s1 + $0xa0] sm:$0xff] }
  0x14   : > { %418 = vmatpush.msra.mxu0 %v797_v11  ;;  %447 = vmatpush.msra.mxu1 %v384_v12  ;;  %v807_v28 = vld [vmem:[%s1164_s1 + $0x98] sm:$0xff]  ;;  %v806_v29 = vld [vmem:[%s1164_s1 + $0x90] sm:$0xff]  ;;  %v530_v40 = vld [vmem:[%s1166_s3 + $0x68] sm:$0xff] }
  0x15   : > { %487 = vmatpush.msra.mxu2 %v811_v22  ;;  %v532_v38 = vld [vmem:[%s1166_s3 + $0x78] sm:$0xff]  ;;  %v531_v39 = vld [vmem:[%s1166_s3 + $0x70] sm:$0xff]  ;;  %v529_v41 = vld [vmem:[%s1166_s3 + $0x60] sm:$0xff] }
  0x16   : > { %419 = vmatpush.msra.mxu0 %v796_v14  ;;  %448 = vmatpush.msra.mxu1 %v383_v15  ;;  %v528_v42 = vld [vmem:[%s1166_s3 + $0x58] sm:$0xff]  ;;  %v527_v43 = vld [vmem:[%s1166_s3 + $0x50] sm:$0xff]  ;;  %v526_v44 = vld [vmem:[%s1166_s3 + $0x48] sm:$0xff] }
  0x17   : > { %371 = vrot.lane.b32.xlu0 %v366_v13, %s852_s21  ;;  %488 = vmatpush.msra.mxu2 %v810_v25  ;;  %v525_v45 = vld [vmem:[%s1166_s3 + $0x40] sm:$0xff]  ;;  %v524_v46 = vld [vmem:[%s1166_s3 + $0x38] sm:$0xff]  ;;  %v523_v47 = vld [vmem:[%s1166_s3 + $0x30] sm:$0xff] }
  0x18   : > { %420 = vmatpush.msra.mxu0 %v795_v17  ;;  %449 = vmatpush.msra.mxu1 %v382_v18  ;;  %v522_v48 = vld [vmem:[%s1166_s3 + $0x28] sm:$0xff]  ;;  %v521_v49 = vld [vmem:[%s1166_s3 + $0x20] sm:$0xff]  ;;  %v520_v50 = vld [vmem:[%s1166_s3 + $0x18] sm:$0xff] }
  0x19   : > { %489 = vmatpush.msra.mxu2 %v809_v26  ;;  %v519_v51 = vld [vmem:[%s1166_s3 + $0x10] sm:$0xff]  ;;  %v518_v52 = vld [vmem:[%s1166_s3 + $0x8] sm:$0xff]  ;;  %v517_v53 = vld [vmem:[%s1166_s3] sm:$0xff] }
  0x1a   : > { %421 = vmatpush.msra.mxu0 %v794_v20  ;;  %450 = vmatpush.msra.mxu1 %v381_v21  ;;  %v555_v56 = vld [vmem:[%s1167_s4] sm:$0xf]  ;;  %v588_v13 = vld [vmem:[%s1169_s6 + $0x18] sm:$0xff]  ;;  %v587_v14 = vld [vmem:[%s1169_s6 + $0x10] sm:$0xff] }
  0x1b   : > { %490 = vmatpush.msra.mxu2 %v808_v27  ;;  %v836_v62 = vld [vmem:[%s1165_s2] ss:$0 sm:$0xff]  ;;  %v586_v16 = vld [vmem:[%s1169_s6 + $0x8] sm:$0xff] }
  0x1c   : > { %422 = vmatpush.msra.mxu0 %v793_v23  ;;  %451 = vmatpush.msra.mxu1 %v380_v24  ;;  %v585_v17 = vld [vmem:[%s1169_s6] sm:$0xff] }
  0x1d   : > { %491 = vmatpush.msra.mxu2 %v807_v28  ;;  %v553_v18 = vld [vmem:[%s1168_s5] sm:$0x1] }
  0x1e   : > { %533 = vmatpush.msrb.mxu0 %v532_v38  ;;  %817 = vmatpush.msk.msrb.mxu1 %vm560_vm3, %v555_v56  ;;  %v554_v22 = vld [vmem:[%s1170_s7] sm:$0x1]  ;;  %v694_v56 = vld [vmem:[%s1172_s9 + $0x38] sm:$0xff] }
  0x1f   : > { %492 = vmatpush.msra.mxu2 %v806_v29 }
  0x20   : > { %534 = vmatpush.msrb.mxu0 %v531_v39 }
  0x22   : > { %535 = vmatpush.msrb.mxu0 %v530_v40 }
  0x24   : > { %536 = vmatpush.msrb.mxu0 %v529_v41 }
  0x26   : > { %537 = vmatpush.msrb.mxu0 %v528_v42 }
  0x28   : > { %538 = vmatpush.msrb.mxu0 %v527_v43 }
  0x2a   : > { %539 = vmatpush.msrb.mxu0 %v526_v44 }
  0x2c   : > { %540 = vmatpush.msrb.mxu0 %v525_v45 }
  0x2e   : > { %541 = vmatpush.msrb.mxu0 %v524_v46 }
  0x30   : > { %542 = vmatpush.msrb.mxu0 %v523_v47 }
  0x32   : > { %543 = vmatpush.msrb.mxu0 %v522_v48  ;;  %v702_v48 = vld [vmem:[%s1172_s9 + $0x78] sm:$0xff] }
  0x33   : > { %703 = vmatpush.msra.mxu3 %v702_v48 }
  0x34   : > { %544 = vmatpush.msrb.mxu0 %v521_v49  ;;  %v701_v49 = vld [vmem:[%s1172_s9 + $0x70] sm:$0xff] }
  0x35   : > { %704 = vmatpush.msra.mxu3 %v701_v49 }
  0x36   : > { %545 = vmatpush.msrb.mxu0 %v520_v50  ;;  %v700_v50 = vld [vmem:[%s1172_s9 + $0x68] sm:$0xff] }
  0x37   : > { %705 = vmatpush.msra.mxu3 %v700_v50 }
  0x38   : > { %546 = vmatpush.msrb.mxu0 %v519_v51  ;;  %v699_v51 = vld [vmem:[%s1172_s9 + $0x60] sm:$0xff] }
  0x39   : > { %706 = vmatpush.msra.mxu3 %v699_v51 }
  0x3a   : > { %547 = vmatpush.msrb.mxu0 %v518_v52  ;;  %v698_v52 = vld [vmem:[%s1172_s9 + $0x58] sm:$0xff] }
  0x3b   : > { %707 = vmatpush.msra.mxu3 %v698_v52 }
  0x3c   : > { %548 = vmatpush.msrb.mxu0 %v517_v53  ;;  %v697_v53 = vld [vmem:[%s1172_s9 + $0x50] sm:$0xff] }
  0x3d   : > { %708 = vmatpush.msra.mxu3 %v697_v53 }
  0x81   : > { %v370_v30 = vpop.permute.xlu0 %369 }
  0x82   : > { %376 = vst.msk [vmem:[#allocation2 + $0x1] sm:$0xff] %vm375_vm2, %v370_v30 }
  0x89   : > { %v372_v31 = vpop.permute.xlu0 %371  ;;  %v389_v32 = vld [vmem:[#allocation2 + $0x1] sm:$0xff] }
  0x8a   : > { %v378_v33 = vld [vmem:[#allocation2] sm:$0xff]  ;;  %377 = vst.msk [vmem:[#allocation2 + $0x9] sm:$0xff] %vm375_vm2, %v372_v31  ;;  %802 = vmatmul.msk.f32.vlgmr.msra.gmra.mxu0 %vm360_vm0, %v389_v32 }
  0x8b   : > { %804 = vmatmul.msk.f32.vlgmr.msra.gmra.mxu1 %vm360_vm0, %v378_v33  ;;  %v659_v33 = vld [vmem:[%s1171_s8] sm:$0xff] }
  0x8c   : > { %605 = vmatpush.msra.mxu1 %v588_v13  ;;  %679 = vmatpush.msrb.mxu2 %v659_v33 }
  0x8e   : > { %606 = vmatpush.msra.mxu1 %v587_v14 }
  0x90   : > { %607 = vmatpush.msra.mxu1 %v586_v16 }
  0x91   : > { %v390_v34 = vld [vmem:[#allocation2 + $0x9] sm:$0xff] }
  0x92   : > { %v379_v35 = vld [vmem:[#allocation2 + $0x8] sm:$0xff]  ;;  %803 = vmatmul.msk.f32.gmra.mxu0 %vm360_vm0, %v390_v34  ;;  %608 = vmatpush.msra.mxu1 %v585_v17 }
  0x93   : > { %v459_v36 = vld [vmem:[#allocation2 + $0x2] sm:$0xff]  ;;  %805 = vmatmul.msk.f32.gmra.mxu1 %vm360_vm0, %v379_v35  ;;  %v460_v37 = vld [vmem:[#allocation2 + $0xa] sm:$0xff] }
  0x94   : > { %815 = vmatmul.msk.f32.vlgmr.msra.gmra.mxu2 %vm360_vm0, %v459_v36 }
  0x9c   : > { %816 = vmatmul.msk.f32.gmra.mxu2 %vm360_vm0, %v460_v37 }
 0x107   : > { %v424_v54 = vpop.f32.mrf.mxu0 }
 0x108   : > { %v453_v55 = vpop.f32.mrf.mxu1 }
 0x109   : > { %v454_v58 = vadd.f32 %v453_v55, %v424_v54  ;;  %v696_v54 = vld [vmem:[%s1172_s9 + $0x48] sm:$0xff]  ;;  %v695_v55 = vld [vmem:[%s1172_s9 + $0x40] sm:$0xff] }
 0x10a   : > { %709 = vmatpush.msra.mxu3 %v696_v54 }
 0x10c   : > { %710 = vmatpush.msra.mxu3 %v695_v55 }
 0x10e   : > { %711 = vmatpush.msra.mxu3 %v694_v56 }
 0x10f   : > { %v427_v59 = vpop.f32.mrf.mxu0 }
 0x110   : > { %v456_v60 = vpop.f32.mrf.mxu1 }
 0x111   : > { %v457_v63 = vadd.f32 %v456_v60, %v427_v59  ;;  %v691_v59 = vld [vmem:[%s1172_s9 + $0x20] sm:$0xff] }
 0x117   : > { %v494_v57 = vpop.f32.mrf.mxu2 }
 0x118   : > { %v500_v61 = vadd.f32 %v494_v57, %v454_v58  ;;  %v693_v57 = vld [vmem:[%s1172_s9 + $0x30] sm:$0xff]  ;;  %v692_v58 = vld [vmem:[%s1172_s9 + $0x28] sm:$0xff] }
 0x119   : > { %712 = vmatpush.msra.mxu3 %v693_v57 }
 0x11a   : > { %v1070_v1 = vadd.f32 %v836_v62, %v500_v61 }
 0x11b   : > { %713 = vmatpush.msra.mxu3 %v692_v58 }
 0x11c   : > { %v508_v4 = vmax.f32 %v1070_v1, 0.0 }
 0x11d   : > { %714 = vmatpush.msra.mxu3 %v691_v59 }
 0x11f   : > { %v497_v0 = vpop.f32.mrf.mxu2 }
 0x120   : > { %v501_v2 = vadd.f32 %v497_v0, %v457_v63  ;;  %v689_v0 = vld [vmem:[%s1172_s9 + $0x10] sm:$0xff] }
 0x122   : > { %v1072_v3 = vadd.f32 %v836_v62, %v501_v2  ;;  %v690_v62 = vld [vmem:[%s1172_s9 + $0x18] sm:$0xff]  ;;  %v688_v2 = vld [vmem:[%s1172_s9 + $0x8] sm:$0xff] }
 0x123   : > { %715 = vmatpush.msra.mxu3 %v690_v62 }
 0x124   : > { %v509_v5 = vmax.f32 %v1072_v3, 0.0 }
 0x125   : > { %716 = vmatpush.msra.mxu3 %v689_v0 }
 0x126   : > { %v510_v6 = vadd.f32 %v509_v5, %v508_v4 }
 0x127   : > { %717 = vmatpush.msra.mxu3 %v688_v2 }
 0x128   : > { %v511_v7 = vrot.slane %v510_v6, 4 }
 0x12a   : > { %v512_v8 = vadd.f32 %v511_v7, %v510_v6  ;;  %v687_v6 = vld [vmem:[%s1172_s9] sm:$0xff] }
 0x12b   : > { %718 = vmatpush.msra.mxu3 %v687_v6 }
 0x12c   : > { %v513_v9 = vrot.slane %v512_v8, 2 }
 0x12e   : > { %v514_v10 = vadd.f32 %v513_v9, %v512_v8 }
 0x130   : > { %v515_v11 = vrot.slane %v514_v10, 1 }
 0x132   : > { %v516_v12 = vadd.f32 %v515_v11, %v514_v10 }
 0x134   : > { %549 = vmatmul.f32.vlgmr.msrb.gmra.mxu0 %v516_v12 }
 0x1b1   : > { %v550_v15 = vpop.f32.mrf.mxu0 }
 0x1b2   : > { %818 = vmatmul.msk.f32.vlgmr.msrb.gmra.mxu1 %vm556_vm4, %v550_v15 }
 0x22f   : > { %v581_v19 = vpop.f32.mrf.mxu1 }
 0x230   : > { %v582_v20 = vadd.f32 %v581_v19, %v553_v18 }
 0x232   : > { %v584_v21 = vmax.f32 %v582_v20, 0.0 }
 0x234   : > { %819 = vmatmul.msk.f32.vlgmr.msra.gmra.mxu1 %vm589_vm5, %v584_v21 }
 0x2b1   : > { %v610_v23 = vpop.f32.mrf.mxu1 }
 0x2b2   : > { %v611_v24 = vadd.f32 %v610_v23, %v554_v22 }
 0x2b4   : > { %614 = vrot.lane.b32.xlu1 %v611_v24, %s853_s24 }
 0x326   : > { %v615_v25 = vpop.permute.xlu1 %614 }
 0x327   : > { %v617_v26 = vmax.f32 %v611_v24, %v615_v25 }
 0x329   : > { %622 = vrot.lane.b32.xlu1 %v617_v26, %s852_s21  ;;  %v618_v31 = vsub.f32 %v611_v24, %v617_v26 }
 0x32b   : > { %v619_v32 = vmul.f32 1.442695, %v618_v31 }
 0x39b   : > { %v623_v27 = vpop.permute.xlu1 %622 }
 0x39c   : > { %v625_v28 = vsub.f32 %v611_v24, %v623_v27 }
 0x39e   : > { %v626_v29 = vmul.f32 1.442695, %v625_v28 }
 0x3a0   : > { %837 = vpow2.f32 %v626_v29 }
 0x3a1   : > { %839 = vpow2.f32 %v619_v32 }
 0x3a6   : > { %v838_v30 = vpop.eup %837 }
 0x3a7   : > { %629 = vrot.lane.b32.xlu2 %v838_v30, %s853_s24  ;;  %v840_v34 = vpop.eup %839 }
 0x401   : > { %v630_v35 = vpop.permute.xlu2 %629 }
 0x402   : > { %v632_v36 = vadd.f32 %v840_v34, %v630_v35 }
 0x404   : > { %841 = vrcp.f32 %v632_v36  ;;  %v644_v40 = vand.u32 2147483648, %v632_v36  ;;  %v642_v42 = vand.u32 2147483647, %v632_v36  ;;  %vm638_vm7 = vweird.f32 %v632_v36 }
 0x406   : > { %v645_v44 = vor.u32 1.1754944e-38, %v644_v40  ;;  %vm643_vm9 = vcmp.eq.f32.partialorder %v642_v42, 8.507059e+37 }
 0x40a   : > { %v842_v37 = vpop.eup %841 }
 0x40b   : > { %v634_v38 = vmul.f32 %v842_v37, %v632_v36  ;;  %vm639_vm6 = vweird.f32 %v842_v37 }
 0x40c   : > { %vm640_vm8 = vmor %vm638_vm7, %vm639_vm6 }
 0x40d   : > { %v635_v39 = vsub.f32 1.0, %v634_v38 }
 0x40f   : > { %v636_v41 = vmul.f32 %v842_v37, %v635_v39 }
 0x411   : > { %v637_v43 = vadd.f32 %v842_v37, %v636_v41 }
 0x413   : > { %v641_v45 = vsel %vm640_vm8, %v842_v37, %v637_v43 }
 0x414   : > { %v646_v46 = vsel %vm643_vm9, %v645_v44, %v641_v45 }
 0x415   : > { %652 = vrot.lane.b32.xlu2 %v646_v46, %s852_s21  ;;  %v648_v47 = vmul.f32 %v840_v34, %v646_v46 }
 0x417   : > { %650 = vst.msk [vmem:[#allocation3] sm:$0x1] %vm649_vm10, %v648_v47 }
 0x46f   : > { %v653_v60 = vpop.permute.xlu2 %652 }
 0x470   : > { %v655_v61 = vmul.f32 %v838_v30, %v653_v60 }
 0x472   : > { %657 = vst.msk [vmem:[#allocation3] sm:$0x1] %vm656_vm11, %v655_v61 }
 0x479   : > { %v658_v63 = vld [vmem:[#allocation3] sm:$0x1] }
 0x47a   : > { %820 = vmatmul.msk.f32.vlgmr.msrb.gmra.mxu2 %vm660_vm12, %v658_v63 }
 0x4fd   : > { %v681_v7 = vpop.f32.mrf.mxu2 }
 0x4fe   : > { %v684_v8 = vperm.slane %v681_v7, 0 }
 0x500   : > { %v685_v9 = vmul.f32 %v684_v8, %v508_v4  ;;  %v686_v10 = vmul.f32 %v684_v8, %v509_v5 }
 0x502   : > { %719 = vmatmul.f32.vlgmr.msra.gmra.mxu3 %v685_v9 }
 0x50a   : > { %722 = vmatmul.f32.gmra.mxu3 %v686_v10 }
 0x585   : > { %v720_v11 = vpop.f32.mrf.mxu3 }
 0x586   : > { %727 = vst.msk [vmem:[%s359_s27] sm:$0xff] %vm726_vm13, %v720_v11 }
 0x58d   : > { %v723_v12 = vpop.f32.mrf.mxu3 }
 0x58e   : > { %728 = vst.msk [vmem:[%s359_s27 + $0x8] sm:$0xff] %vm726_vm13, %v723_v12 }
 0x58f PF: > { %s20_s13 = sadd.s32 1, %s849_s13  }
 0x590   : > { %p17_p4 = scmp.ge.s32.totalorder %s20_s13, 4  }
 0x592   :  { %19 = sbr.rel (!%p17_p4) target bundleno = 1 (0x1), region = 92 }

</bundles_post_ra>
